<compile_context>
chip_gen: v7x
topology: tpu7x:2x2x1
jax: 0.10.0
libtpu: 0.0.40
codegen_flags: <defaults>
</compile_context>

<pallas_src>
import jax
import jax.numpy as jnp
from jax.experimental import pallas as pl
from jax.experimental.pallas import tpu as pltpu

_LANE = 128      # vreg lane width
_SUBLANE = 8     # vreg sublane count (f32)


def _round_up(a: int, b: int) -> int:
    return (a + b - 1) // b * b


def _hardsigmoid_kernel(x_ref, o_ref):
    # Up-cast to f32 for the VPU ops (v5e has no bf16 VPU path), store back in
    # the output's storage dtype.
    x = x_ref[...].astype(jnp.float32)
    o_ref[...] = (jnp.clip(x + 3.0, 0.0, 6.0) * (1.0 / 6.0)).astype(o_ref.dtype)


def hard_sigmoid(x, *, target_cols: int = 512, target_block_rows: int = 512):
    """Elementwise HardSigmoid over an arbitrarily shaped array.

    The array is flattened into a lane-dense (rows, cols) slab with
    cols a multiple of 128, then processed in (block_rows, cols) tiles over a
    1-D grid (double-buffered by the BlockSpec pipeline).
    """
    orig_shape = x.shape
    orig_dtype = x.dtype
    n = int(x.size)
    if n == 0:
        return x

    # Lane-dense column width: multiple of 128, capped at target_cols.
    cols = min(target_cols, _round_up(n, _LANE))
    rows = pl.cdiv(n, cols)
    rows = _round_up(rows, _SUBLANE)
    block_rows = min(target_block_rows, rows)          # multiple of 8 either way
    rows = _round_up(rows, block_rows)                 # grid divides evenly
    padded = rows * cols

    flat = jnp.ravel(x)
    if padded != n:
        flat = jnp.pad(flat, (0, padded - n))
    x2d = flat.reshape(rows, cols)

    grid = (rows // block_rows,)
    itemsize = jnp.dtype(orig_dtype).itemsize

    out2d = pl.pallas_call(
        _hardsigmoid_kernel,
        out_shape=jax.ShapeDtypeStruct((rows, cols), orig_dtype),
        grid=grid,
        in_specs=[pl.BlockSpec((block_rows, cols), lambda i: (i, 0))],
        out_specs=pl.BlockSpec((block_rows, cols), lambda i: (i, 0)),
        compiler_params=pltpu.CompilerParams(
            dimension_semantics=("parallel",),          # v7x: 2 TCs split the grid
        ),
        cost_estimate=pl.CostEstimate(
            flops=3 * padded,
            transcendentals=0,
            bytes_accessed=2 * padded * itemsize,
        ),
    )(x2d)

    return out2d.reshape(-1)[:n].reshape(orig_shape)


if __name__ == "__main__":
    key = jax.random.PRNGKey(0)
    k1, k2 = jax.random.split(key)

    # NCHW-style input, matching the module's usage inside MobileNetV3.
    x = jax.random.normal(k1, (2, 4, 16, 16), jnp.float32) * 4.0

    fwd = jax.jit(hard_sigmoid)
    out = fwd(x)
    jax.block_until_ready(out)

    ref = jnp.clip(x + 3.0, 0.0, 6.0) / 6.0
    assert out.shape == x.shape and out.dtype == x.dtype
    assert jnp.allclose(out, ref, atol=1e-6, rtol=1e-6), float(
        jnp.max(jnp.abs(out - ref)))

    # bf16 storage path (halves DMA traffic; f32 math inside the kernel).
    xb = jax.random.normal(k2, (3, 7, 11, 13), jnp.bfloat16) * 4.0
    outb = jax.block_until_ready(jax.jit(hard_sigmoid)(xb))
    refb = (jnp.clip(xb.astype(jnp.float32) + 3.0, 0.0, 6.0) / 6.0).astype(
        jnp.bfloat16)
    assert outb.shape == xb.shape and outb.dtype == jnp.bfloat16
    assert jnp.allclose(outb.astype(jnp.float32), refb.astype(jnp.float32),
                        atol=1e-2, rtol=1e-2)

    print("KERNEL_OK")
</pallas_src>

<mosaic_0001>
module attributes {stable_mosaic.version = 11 : i64} {
  func.func @_hardsigmoid_kernel(%arg0: i32, %arg1: memref<8x512xf32, #tpu.memory_space<vmem>>, %arg2: memref<8x512xf32, #tpu.memory_space<vmem>>) attributes {dimension_semantics = [#tpu.dimension_semantics<parallel>], iteration_bounds = array<i64: 1>, scalar_prefetch = 0 : i64, scratch_operands = 0 : i64, tpu.core_type = #tpu.core_type<tc>, window_params = [{transform_indices = @transform_0, window_bounds = array<i64: 8, 512>}, {transform_indices = @transform_1, window_bounds = array<i64: 8, 512>}]} {
    %c0 = arith.constant 0 : index
    %c0_0 = arith.constant 0 : index
    %0 = vector.load %arg1[%c0, %c0_0] : memref<8x512xf32, #tpu.memory_space<vmem>>, vector<8x512xf32>
    %cst = arith.constant 3.000000e+00 : f32
    %1 = vector.broadcast %cst : f32 to vector<8x512xf32>
    %2 = arith.addf %0, %1 : vector<8x512xf32>
    %cst_1 = arith.constant 0.000000e+00 : f32
    %cst_2 = arith.constant 6.000000e+00 : f32
    %3 = vector.broadcast %cst_1 : f32 to vector<8x512xf32>
    %4 = arith.maximumf %3, %2 : vector<8x512xf32>
    %5 = vector.broadcast %cst_2 : f32 to vector<8x512xf32>
    %6 = arith.minimumf %5, %4 : vector<8x512xf32>
    %cst_3 = arith.constant 0.166666672 : f32
    %7 = vector.broadcast %cst_3 : f32 to vector<8x512xf32>
    %8 = arith.mulf %6, %7 : vector<8x512xf32>
    %c0_4 = arith.constant 0 : index
    %c0_5 = arith.constant 0 : index
    %9 = vector.load %arg2[%c0_4, %c0_5] : memref<8x512xf32, #tpu.memory_space<vmem>>, vector<8x512xf32>
    tpu.vector_store %arg2[%c0_4, %c0_5], %8 {strides = array<i32>} : memref<8x512xf32, #tpu.memory_space<vmem>>, vector<8x512xf32>,
    return
  }
  func.func @transform_0(%arg0: i32) -> (i32, i32) {
    %c0_i32 = arith.constant 0 : i32
    %c0_i32_0 = arith.constant 0 : i32
    return %arg0, %c0_i32 : i32, i32
  }
  func.func @transform_1(%arg0: i32) -> (i32, i32) {
    %c0_i32 = arith.constant 0 : i32
    %c0_i32_0 = arith.constant 0 : i32
    return %arg0, %c0_i32 : i32, i32
  }
}

</mosaic_0001>

<bundles_post_ra>
// kernel: hard_sigmoid.1
= control target key start
LH: loop header
LB: loop body
LE: loop exit
PB: predicated region body
PF: predicated region fallthrough
CT: control target
= control target key end

     0   :  { %s70_s0 = inlined_call_operand.vmem [shape: f32[8,512], index: 0, kind: input, shape index: {}]   ;;  %s71_s1 = inlined_call_operand.vmem [shape: f32[8,512], index: 1, kind: output, shape index: {}]  }
   0x1   :  { %v8_v0 = vld [vmem:[%s70_s0] sm:$0xff]  ;;  %v9_v1 = vld [vmem:[%s70_s0 + $0x8] sm:$0xff]  ;;  %v10_v2 = vld [vmem:[%s70_s0 + $0x10] sm:$0xff] }
   0x2   :  { %v12_v3 = vadd.f32 3.0, %v8_v0  ;;  %v13_v4 = vadd.f32 3.0, %v9_v1  ;;  %v14_v5 = vadd.f32 3.0, %v10_v2  ;;  %v11_v6 = vld [vmem:[%s70_s0 + $0x18] sm:$0xff] }
   0x3   :  { %v15_v7 = vadd.f32 3.0, %v11_v6 }
   0x4   :  { %v16_v8 = vmax.f32 %v12_v3, 0.0  ;;  %v17_v9 = vmax.f32 %v13_v4, 0.0  ;;  %v18_v10 = vmax.f32 %v14_v5, 0.0 }
   0x5   :  { %v19_v11 = vmax.f32 %v15_v7, 0.0 }
   0x6   :  { %v20_v12 = vmin.f32 %v16_v8, 6.0  ;;  %v21_v13 = vmin.f32 %v17_v9, 6.0  ;;  %v22_v14 = vmin.f32 %v18_v10, 6.0 }
   0x7   :  { %v23_v15 = vmin.f32 %v19_v11, 6.0 }
   0x8   :  { %v24_v16 = vmul.f32 0.16666667, %v20_v12  ;;  %v25_v17 = vmul.f32 0.16666667, %v21_v13  ;;  %v26_v18 = vmul.f32 0.16666667, %v22_v14 }
   0x9   :  { %v27_v19 = vmul.f32 0.16666667, %v23_v15 }
   0xa   :  { %28 = vst [vmem:[%s71_s1] sm:$0xff] %v24_v16  ;;  %29 = vst [vmem:[%s71_s1 + $0x8] sm:$0xff] %v25_v17 }
   0xb   :  { %30 = vst [vmem:[%s71_s1 + $0x10] sm:$0xff] %v26_v18  ;;  %31 = vst [vmem:[%s71_s1 + $0x18] sm:$0xff] %v27_v19 }

</bundles_post_ra>
